<compile_context>
chip_gen: v5e
topology: v5e:2x2
jax: 0.10.0
libtpu: 0.0.40
codegen_flags: <defaults>
</compile_context>

<pallas_src>
import math

import jax
import jax.numpy as jnp
from jax import lax
from jax.experimental import pallas as pl
from jax.experimental.pallas import tpu as pltpu


def _round_up(x, m):
    return (x + m - 1) // m * m


def _cdiv(a, b):
    return -(-a // b)


def _choose_tile(length, target, align):
    """Full-extent block when the dim fits in one target-sized block, otherwise
    a balanced, `align`-aligned tile (bounds per-block imbalance/waste)."""
    if length <= target:
        return length
    n_blocks = _cdiv(length, target)
    return _round_up(_cdiv(length, n_blocks), align)


def _block_vmem_bytes(tm_b, tn_b, h, v_rows, in_itemsize, out_itemsize):
    """Rough double-buffered VMEM footprint of all pipeline blocks."""
    lane = lambda n: _round_up(max(n, 1), 128)
    sub = lambda n: _round_up(max(n, 1), 8)
    u_blk = sub(tm_b) * lane(h) * in_itemsize
    v_blk = sub(v_rows) * lane(h) * in_itemsize
    ub_blk = sub(tm_b) * lane(1) * 4
    vb_blk = sub(1) * lane(tn_b) * 4
    w3_blk = sub(1) * lane(h) * 4
    o_blk = sub(tm_b) * lane(tn_b) * out_itemsize
    return 2 * (u_blk + v_blk + ub_blk + vb_blk + w3_blk + o_blk)


def _make_kernel(tn, resident_v, precision):
    def kernel(u_ref, v_ref, ub_ref, vb_ref, w3_ref, o_ref):
        u = u_ref[0]                                       # (TM, H)
        if resident_v:
            # v block holds the whole (padded) sequence for this batch element;
            # slice out the TN rows for this j step.
            j = pl.program_id(2)
            start = pl.multiple_of(j * tn, tn)
            v = v_ref[0, pl.ds(start, tn), :]              # (TN, H)
        else:
            v = v_ref[0]                                   # (TN, H)
        # (w3 * u) @ v^T with the transpose folded into the MXU feed (contract
        # on the last dim of both operands; no XLU transpose).  The w3 scale is
        # ~1/TN of the MXU work and hides under it, so it stays in-kernel.
        part3 = lax.dot_general(
            u * w3_ref[...], v,
            dimension_numbers=(((1,), (1,)), ((), ())),
            preferred_element_type=jnp.float32,
            precision=precision)
        # Pre-folded biases: ub = u@w1 + b1 + (1-u_mask)*-1e4   -> (TM, 1)
        #                    vb = v@w2 + b2 + (1-v_mask)*-1e4   -> (1, TN)
        o_ref[0] = (part3 + ub_ref[0] + vb_ref[0]).astype(o_ref.dtype)
    return kernel


def trilinear_att(u, u_mask, v, v_mask, w1, b1, w2, b2, w3, *,
                  tm=512, tn=512, out_dtype=jnp.float32,
                  vmem_budget=40 * 2 ** 20):
    """u: (B, Lu, H); v: (B, Lv, H); u_mask: (B, Lu); v_mask: (B, Lv).
    w1, w2: (H, 1); b1, b2: scalars; w3: (1, H).  Returns (B, Lu, Lv)."""
    B, Lu, H = u.shape
    Bv, Lv, Hv = v.shape
    assert Bv == B and Hv == H

    # Keep activations in their native floating dtype (bf16 feeds the MXU
    # directly and halves reads); everything else is folded in f32.
    if u.dtype not in (jnp.float32, jnp.bfloat16):
        u = u.astype(jnp.float32)
    v = v.astype(u.dtype)
    compute_dtype = u.dtype
    in_itemsize = jnp.dtype(compute_dtype).itemsize
    out_itemsize = jnp.dtype(out_dtype).itemsize

    w1 = jnp.asarray(w1, jnp.float32).reshape(H, 1)
    w2 = jnp.asarray(w2, jnp.float32).reshape(H, 1)
    w3 = jnp.asarray(w3, compute_dtype).reshape(1, H)
    b1 = jnp.asarray(b1, jnp.float32)
    b2 = jnp.asarray(b2, jnp.float32)

    # Fold part1 / part2 and the -1e4 mask terms into two tiny bias vectors
    # (removes two N=1 matmuls, one transpose and four operands from the kernel).
    u_bias = (jnp.einsum('blh,hk->blk', u, w1.astype(compute_dtype),
                         preferred_element_type=jnp.float32)
              + b1 + (1.0 - u_mask.astype(jnp.float32))[..., None] * -10000.0)
    v_bias = (jnp.einsum('blh,hk->blk', v, w2.astype(compute_dtype),
                         preferred_element_type=jnp.float32)
              + b2 + (1.0 - v_mask.astype(jnp.float32))[..., None] * -10000.0)
    v_bias = jnp.transpose(v_bias, (0, 2, 1))                       # (B, 1, Lv)

    # --- Tile selection ------------------------------------------------------
    # Shrink tile *targets* first if a very large H would blow the VMEM budget
    # (rare); then pick balanced, aligned tiles.  TM is sublane-aligned (8),
    # TN is lane-dense (128) so output stores are unmasked vst.
    while (_block_vmem_bytes(min(tm, _round_up(Lu, 8)),
                             min(tn, _round_up(Lv, 128)), H,
                             min(tn, _round_up(Lv, 128)),
                             in_itemsize, out_itemsize) > vmem_budget
           and (tm > 128 or tn > 128)):
        if tm >= tn:
            tm = max(tm // 2, 8)
        else:
            tn = max(tn // 2, 128)

    TM = _choose_tile(Lu, tm, 8)
    TN = _choose_tile(Lv, tn, 128)
    ni = _cdiv(Lu, TM)
    nj = _cdiv(Lv, TN)

    # --- Resident-v: stop re-streaming v across the i (Lu) axis --------------
    v_in = v
    Lv_res = nj * TN
    needs_v_pad = (Lv_res != Lv)
    resident_bytes = _block_vmem_bytes(TM, TN, H, Lv_res, in_itemsize,
                                       out_itemsize)
    resident_v = (
        nj > 1 and ni > 1
        and resident_bytes <= vmem_budget
        # Padding v costs ~2 extra passes over v; only pay it when it saves more.
        and (not needs_v_pad or ni >= 4))
    if resident_v and needs_v_pad:
        v_in = jnp.pad(v, ((0, 0), (0, Lv_res - Lv), (0, 0)))

    if resident_v:
        v_spec = pl.BlockSpec((1, v_in.shape[1], H), lambda b, i, j: (b, 0, 0))
        blocks_vmem = resident_bytes
    else:
        v_spec = pl.BlockSpec((1, TN, H), lambda b, i, j: (b, j, 0))
        blocks_vmem = _block_vmem_bytes(TM, TN, H, TN, in_itemsize, out_itemsize)

    grid = (B, ni, nj)

    v_reads = 1 if (resident_v or ni == 1) else ni
    flops = 2 * B * Lu * Lv * H
    bytes_accessed = int(B * (Lu * H * in_itemsize
                              + v_reads * Lv * H * in_itemsize
                              + Lu * Lv * out_itemsize
                              + Lu * 4 + Lv * 4))

    # f32 parity with the PyTorch reference is essentially free (mem-bound).
    precision = (lax.Precision.HIGHEST if compute_dtype == jnp.float32
                 else lax.Precision.DEFAULT)

    # Raise the scoped-VMEM limit (v5e defaults to 16 MiB); harmless elsewhere.
    vmem_limit = int(min(64 * 2 ** 20, max(32 * 2 ** 20, blocks_vmem * 3 // 2)))

    kernel = _make_kernel(TN, resident_v, precision)

    out = pl.pallas_call(
        kernel,
        out_shape=jax.ShapeDtypeStruct((B, Lu, Lv), out_dtype),
        grid_spec=pltpu.PrefetchScalarGridSpec(
            num_scalar_prefetch=0,
            grid=grid,
            in_specs=[
                pl.BlockSpec((1, TM, H), lambda b, i, j: (b, i, 0)),   # u
                v_spec,                                                # v
                pl.BlockSpec((1, TM, 1), lambda b, i, j: (b, i, 0)),   # u_bias
                pl.BlockSpec((1, 1, TN), lambda b, i, j: (b, 0, j)),   # v_bias
                pl.BlockSpec((1, H), lambda b, i, j: (0, 0)),          # w3
            ],
            out_specs=pl.BlockSpec((1, TM, TN), lambda b, i, j: (b, i, j)),
        ),
        compiler_params=pltpu.CompilerParams(
            dimension_semantics=("parallel", "parallel", "parallel"),
            vmem_limit_bytes=vmem_limit),
        cost_estimate=pl.CostEstimate(
            flops=flops, transcendentals=0, bytes_accessed=bytes_accessed),
    )(u, v_in, u_bias, v_bias, w3)

    return out


def _reference(u, u_mask, v, v_mask, w1, b1, w2, b2, w3):
    part1 = u @ w1 + b1                                    # (B, Lu, 1)
    part2 = jnp.transpose(v @ w2 + b2, (0, 2, 1))          # (B, 1, Lv)
    part3 = jnp.einsum('blh,bmh->blm', w3[None] * u, v,
                       precision=lax.Precision.HIGHEST)    # (B, Lu, Lv)
    um = (1.0 - u_mask.astype(jnp.float32)) * -10000.0
    vm = (1.0 - v_mask.astype(jnp.float32)) * -10000.0
    return part1 + part2 + part3 + um[:, :, None] + vm[:, None, :]


if __name__ == "__main__":
    key = jax.random.PRNGKey(0)
    H = 32
    lin_bound = 1.0 / math.sqrt(H)      # nn.Linear default init bound
    w3_bound = math.sqrt(1.0 / H)       # kaiming_uniform(a=sqrt(5)), fan_in=H

    # (B, Lu, Lv, tm, tn):
    #   1) full-extent single block (tiny, ragged dims)
    #   2) streaming path with partial last blocks on both axes
    #   3) resident-v path (v padded to a TN multiple; output never padded)
    cases = [
        (2, 10, 12, 512, 512),
        (2, 136, 200, 64, 128),
        (1, 320, 200, 64, 128),
    ]

    for idx, (B, Lu, Lv, tm, tn) in enumerate(cases):
        ks = jax.random.split(jax.random.fold_in(key, idx), 9)
        u = jax.random.normal(ks[0], (B, Lu, H), dtype=jnp.float32)
        v = jax.random.normal(ks[1], (B, Lv, H), dtype=jnp.float32)
        u_mask = (jax.random.uniform(ks[2], (B, Lu)) > 0.2).astype(jnp.float32)
        v_mask = (jax.random.uniform(ks[3], (B, Lv)) > 0.2).astype(jnp.float32)
        w1 = jax.random.uniform(ks[4], (H, 1), minval=-lin_bound, maxval=lin_bound)
        b1 = jax.random.uniform(ks[5], (), minval=-lin_bound, maxval=lin_bound)
        w2 = jax.random.uniform(ks[6], (H, 1), minval=-lin_bound, maxval=lin_bound)
        b2 = jax.random.uniform(ks[7], (), minval=-lin_bound, maxval=lin_bound)
        w3 = jax.random.uniform(ks[8], (1, H), minval=-w3_bound, maxval=w3_bound)

        out = trilinear_att(u, u_mask, v, v_mask, w1, b1, w2, b2, w3, tm=tm, tn=tn)
        out = jax.block_until_ready(out)

        ref = _reference(u, u_mask, v, v_mask, w1, b1, w2, b2, w3)
        assert out.shape == (B, Lu, Lv)
        assert jnp.allclose(out, ref, atol=1e-4, rtol=1e-4), f"mismatch in case {idx}"

    print("KERNEL_OK")
</pallas_src>

<mosaic_0001>
module attributes {stable_mosaic.version = 11 : i64} {
  func.func @kernel(%arg0: i32, %arg1: i32, %arg2: i32, %arg3: memref<1x10x32xf32, #tpu.memory_space<vmem>>, %arg4: memref<1x12x32xf32, #tpu.memory_space<vmem>>, %arg5: memref<1x10x1xf32, #tpu.memory_space<vmem>>, %arg6: memref<1x1x12xf32, #tpu.memory_space<vmem>>, %arg7: memref<1x32xf32, #tpu.memory_space<vmem>>, %arg8: memref<1x10x12xf32, #tpu.memory_space<vmem>>) attributes {dimension_semantics = [#tpu.dimension_semantics<parallel>, #tpu.dimension_semantics<parallel>, #tpu.dimension_semantics<parallel>], iteration_bounds = array<i64: 2, 1, 1>, scalar_prefetch = 0 : i64, scratch_operands = 0 : i64, tpu.core_type = #tpu.core_type<tc>, window_params = [{transform_indices = @transform_0, window_bounds = array<i64: 1, 10, 32>}, {transform_indices = @transform_1, window_bounds = array<i64: 1, 12, 32>}, {transform_indices = @transform_2, window_bounds = array<i64: 1, 10, 1>}, {transform_indices = @transform_3, window_bounds = array<i64: 1, 1, 12>}, {pipeline_mode = #tpu.pipeline_mode<synchronous>, transform_indices = @transform_4, window_bounds = array<i64: 1, 32>}, {transform_indices = @transform_5, window_bounds = array<i64: 1, 10, 12>}]} {
    %c0 = arith.constant 0 : index
    %c0_0 = arith.constant 0 : index
    %c0_1 = arith.constant 0 : index
    %0 = vector.load %arg3[%c0, %c0_0, %c0_1] : memref<1x10x32xf32, #tpu.memory_space<vmem>>, vector<1x10x32xf32>
    %1 = vector.shape_cast %0 : vector<1x10x32xf32> to vector<10x32xf32>
    %c0_2 = arith.constant 0 : index
    %c0_3 = arith.constant 0 : index
    %c0_4 = arith.constant 0 : index
    %2 = vector.load %arg4[%c0_2, %c0_3, %c0_4] : memref<1x12x32xf32, #tpu.memory_space<vmem>>, vector<1x12x32xf32>
    %3 = vector.shape_cast %2 : vector<1x12x32xf32> to vector<12x32xf32>
    %c0_5 = arith.constant 0 : index
    %c0_6 = arith.constant 0 : index
    %4 = vector.load %arg7[%c0_5, %c0_6] : memref<1x32xf32, #tpu.memory_space<vmem>>, vector<1x32xf32>
    %5 = vector.broadcast %4 : vector<1x32xf32> to vector<10x32xf32>
    %6 = arith.mulf %1, %5 : vector<10x32xf32>
    %cst = arith.constant dense<0.000000e+00> : vector<10x12xf32>
    %7 = tpu.matmul %6, %3, %cst {dimension_numbers = #tpu.dot_dimension_numbers<[1], [1], [0], [0], [0, 0, 1, 0], [], []>, precision = #tpu.contract_precision<fp32>} : vector<10x32xf32>, vector<12x32xf32>, vector<10x12xf32> -> vector<10x12xf32>
    %c0_7 = arith.constant 0 : index
    %c0_8 = arith.constant 0 : index
    %c0_9 = arith.constant 0 : index
    %8 = vector.load %arg5[%c0_7, %c0_8, %c0_9] : memref<1x10x1xf32, #tpu.memory_space<vmem>>, vector<1x10x1xf32>
    %9 = vector.shape_cast %8 : vector<1x10x1xf32> to vector<10x1xf32>
    %10 = vector.broadcast %9 : vector<10x1xf32> to vector<10x12xf32>
    %11 = arith.addf %7, %10 : vector<10x12xf32>
    %c0_10 = arith.constant 0 : index
    %c0_11 = arith.constant 0 : index
    %c0_12 = arith.constant 0 : index
    %12 = vector.load %arg6[%c0_10, %c0_11, %c0_12] : memref<1x1x12xf32, #tpu.memory_space<vmem>>, vector<1x1x12xf32>
    %13 = vector.shape_cast %12 : vector<1x1x12xf32> to vector<1x12xf32>
    %14 = vector.broadcast %13 : vector<1x12xf32> to vector<10x12xf32>
    %15 = arith.addf %11, %14 : vector<10x12xf32>
    %c0_13 = arith.constant 0 : index
    %c0_14 = arith.constant 0 : index
    %c0_15 = arith.constant 0 : index
    %16 = vector.load %arg8[%c0_13, %c0_14, %c0_15] : memref<1x10x12xf32, #tpu.memory_space<vmem>>, vector<1x10x12xf32>
    %17 = vector.shape_cast %16 : vector<1x10x12xf32> to vector<10x12xf32>
    %18 = vector.shape_cast %15 : vector<10x12xf32> to vector<1x10x12xf32>
    tpu.vector_store %arg8[%c0_13, %c0_14, %c0_15], %18 {strides = array<i32>} : memref<1x10x12xf32, #tpu.memory_space<vmem>>, vector<1x10x12xf32>,
    return
  }
  func.func @transform_0(%arg0: i32, %arg1: i32, %arg2: i32) -> (i32, i32, i32) {
    %c0_i32 = arith.constant 0 : i32
    %c0_i32_0 = arith.constant 0 : i32
    return %arg0, %arg1, %c0_i32 : i32, i32, i32
  }
  func.func @transform_1(%arg0: i32, %arg1: i32, %arg2: i32) -> (i32, i32, i32) {
    %c0_i32 = arith.constant 0 : i32
    %c0_i32_0 = arith.constant 0 : i32
    return %arg0, %arg2, %c0_i32 : i32, i32, i32
  }
  func.func @transform_2(%arg0: i32, %arg1: i32, %arg2: i32) -> (i32, i32, i32) {
    %c0_i32 = arith.constant 0 : i32
    %c0_i32_0 = arith.constant 0 : i32
    return %arg0, %arg1, %c0_i32 : i32, i32, i32
  }
  func.func @transform_3(%arg0: i32, %arg1: i32, %arg2: i32) -> (i32, i32, i32) {
    %c0_i32 = arith.constant 0 : i32
    %c0_i32_0 = arith.constant 0 : i32
    return %arg0, %c0_i32, %arg2 : i32, i32, i32
  }
  func.func @transform_4(%arg0: i32, %arg1: i32, %arg2: i32) -> (i32, i32) {
    %c0_i32 = arith.constant 0 : i32
    %c0_i32_0 = arith.constant 0 : i32
    %c0_i32_1 = arith.constant 0 : i32
    return %c0_i32, %c0_i32_0 : i32, i32
  }
  func.func @transform_5(%arg0: i32, %arg1: i32, %arg2: i32) -> (i32, i32, i32) {
    %c0_i32 = arith.constant 0 : i32
    return %arg0, %arg1, %arg2 : i32, i32, i32
  }
}

</mosaic_0001>

<bundles_post_ra>
// kernel: tpu_custom_call.1
= control target key start
LH: loop header
LB: loop body
LE: loop exit
PB: predicated region body
PF: predicated region fallthrough
CT: control target
= control target key end

     0   :  { %s865_s18 = smov 0   ;;  %s867_s19 = smov 0   ;;  %s924_s0 = inlined_call_operand.vmem [shape: f32[2,10,32], index: 0, kind: input, shape index: {}]   ;;  %s925_s1 = inlined_call_operand.vmem [shape: f32[2,12,32], index: 1, kind: input, shape index: {}]   ;;  %s926_s2 = inlined_call_operand.vmem [shape: f32[2,10,1], index: 2, kind: input, shape index: {}]   ;;  %s927_s3 = inlined_call_operand.vmem [shape: f32[2,1,12], index: 3, kind: input, shape index: {}]   ;;  %s928_s4 = inlined_call_operand.vmem [shape: f32[1,32], index: 4, kind: input, shape index: {}]   ;;  %s929_s5 = inlined_call_operand.vmem [shape: f32[2,10,12], index: 5, kind: output, shape index: {}]  }
   0x1   :  { %s869_s20 = smov 0  }
   0x2 LB: > { %s34_s21 = sadd.s32 1, %s828_s19  ;;  %p763_p0 = scmp.ge.s32.totalorder %s832_s20, 1  ;;  %s832_s20 = sphi %s869_s20, %s15_s20   ;;  %s828_s19 = sphi %s867_s19, %s931_s19   ;;  %s824_s18 = sphi %s865_s18, %s930_s18  }
   0x3   : > { %p36_p1 = scmp.ge.s32.totalorder %s34_s21, 2  ;;  %p264_p2 = scmp.lt.s32.totalorder %s832_s20, 3 }
   0x5   : > { %s933_s21 = smov (%p36_p1, %s34_s21), 0  ;;  %p265_p3 = pnand %p763_p0, %p264_p2 }
   0x6   : > { %p328_p4 = scmp.lt.s32.totalorder (!%p265_p3), %s824_s18, 1 }
   0x7   : > { %268 = sbr.rel (%p265_p3) target bundleno = 192 (0xc0), region = 40 }
   0xc   : > { %s935_s18 = smov (!%p328_p4, %s824_s18), 1  ;;  %v834_v0 = vmov 0   ;;  %v808_v1 = vld [vmem:[%s928_s4] ss:$0 sm:$0xff]  ;;  %vm398_vm0 = vcmask 261120   ;;  %vm607_vm1 = vcmask 97280  }
   0xd   : > { %807 = vset.pattern.permute.xlu0 %v834_v0  ;;  %s889_s24 = sshll.u32 %s935_s18, 4  ;;  %s362_s11 = scalar_lea.vmem %s927_s3, %s935_s18  ;;  %vm609_vm2 = vcmask 91136  }
   0xe   : > { %s345_s27 = scalar_lea.vmem %s925_s1, %s889_s24  ;;  %s335_s30 = scalar_lea.vmem %s924_s0, %s889_s24  ;;  %v809_v50 = vld [vmem:[%s362_s11] ss:$0 sm:$0xff] }
   0xf   : > { %v379_v2 = vld [vmem:[%s345_s27 + $0x8] sm:$0xf]  ;;  %v378_v3 = vld [vmem:[%s345_s27] sm:$0xff]  ;;  %s355_s8 = scalar_lea.vmem %s926_s2, %s889_s24  ;;  %s374_s14 = scalar_lea.vmem %s929_s5, %s889_s24 }
  0x10   : > { %v377_v4 = vld [vmem:[%s335_s30 + $0x8] sm:$0x3]  ;;  %v409_v5 = vsel %vm398_vm0, %v379_v2, 0  ;;  %v406_v6 = vsel %vm398_vm0, %v378_v3, 0  ;;  %v376_v8 = vld [vmem:[%s335_s30] sm:$0xff] }
  0x11   : > { %v385_v7 = vmul.f32 %v808_v1, %v377_v4  ;;  %v386_v9 = vld [vmem:[%s355_s8] sm:$0xff]  ;;  %v425_v10 = vand.u32 4294901760, %v409_v5  ;;  %v427_v11 = vand.u32 4294901760, %v406_v6  ;;  %v384_v12 = vmul.f32 %v808_v1, %v376_v8  ;;  %v387_v23 = vld [vmem:[%s355_s8 + $0x8] sm:$0x3] }
  0x12   : > { %390 = vperm.xlu0 %807, %v386_v9  }
  0x13   : > { %v403_v13 = vsel %vm398_vm0, %v385_v7, 0  ;;  %778 = vmatpush.xpose.msra.mxu2 %v425_v10  ;;  %v461_v14 = vsub.f32 %v409_v5, %v425_v10  ;;  %v467_v16 = vsub.f32 %v406_v6, %v427_v11  ;;  %426 = vmatpush.xpose.msra.mxu0 %v425_v10  ;;  %v400_v17 = vsel %vm398_vm0, %v384_v12, 0 }
  0x14   : > { %v437_v15 = vand.u32 4294901760, %v403_v13  ;;  %v429_v18 = vand.u32 4294901760, %v400_v17 }
  0x15   : > { %v462_v19 = vand.u32 4294901760, %v461_v14  ;;  %v468_v21 = vand.u32 4294901760, %v467_v16 }
  0x16   : > { %v438_v20 = vsub.f32 %v403_v13, %v437_v15  ;;  %v430_v22 = vsub.f32 %v400_v17, %v429_v18 }
  0x17   : > { %779 = vmatpush.xpose.msra.mxu2 %v427_v11  ;;  %v463_v24 = vsub.f32 %v461_v14, %v462_v19  ;;  %v469_v26 = vsub.f32 %v467_v16, %v468_v21  ;;  %428 = vmatpush.xpose.msra.mxu0 %v427_v11 }
  0x18   : > { %v439_v25 = vand.u32 4294901760, %v438_v20  ;;  %v431_v27 = vand.u32 4294901760, %v430_v22 }
  0x19   : > { %v464_v28 = vand.u32 4294901760, %v463_v24  ;;  %v470_v32 = vand.u32 4294901760, %v469_v26 }
  0x1a   : > { %v440_v29 = vsub.f32 %v438_v20, %v439_v25  ;;  %395 = vperm.xlu0 %807, %v387_v23   ;;  %v432_v30 = vsub.f32 %v430_v22, %v431_v27 }
  0x1b   : > { %497 = vmatpush.xpose.msrb.mxu2 %v461_v14  ;;  %560 = vmatpush.xpose.msrb.mxu0 %v462_v19 }
  0x1c   : > { %780 = vmatpush.xpose.msra.mxu3 %v464_v28  ;;  %v441_v31 = vand.u32 4294901760, %v440_v29  ;;  %465 = vmatpush.xpose.msra.mxu1 %v464_v28  ;;  %v433_v33 = vand.u32 4294901760, %v432_v30 }
  0x1e   : > { %442 = vmatmul.f32.vlgmr.msra.gmra.mxu2 %v441_v31  ;;  %434 = vmatmul.f32.vlgmr.msra.gmra.mxu0 %v433_v33 }
  0x1f   : > { %500 = vmatpush.xpose.msrb.mxu2 %v467_v16  ;;  %564 = vmatpush.xpose.msrb.mxu0 %v468_v21 }
  0x20   : > { %781 = vmatpush.xpose.msra.mxu3 %v470_v32  ;;  %471 = vmatpush.xpose.msra.mxu1 %v470_v32 }
  0x23   : > { %477 = vmatmul.f32.vlgmr.msra.gmra.mxu3 %v437_v15  ;;  %473 = vmatmul.f32.vlgmr.msra.gmra.mxu1 %v429_v18 }
  0x24   : > { %527 = vmatpush.xpose.msrb.mxu3 %v425_v10  ;;  %589 = vmatpush.xpose.msrb.mxu1 %v425_v10 }
  0x26   : > { %503 = vmatmul.f32.vlgmr.msrb.gmra.mxu2 %v430_v22  ;;  %566 = vmatmul.f32.vlgmr.msrb.gmra.mxu0 %v429_v18 }
  0x28   : > { %529 = vmatpush.xpose.msrb.mxu3 %v427_v11  ;;  %591 = vmatpush.xpose.msrb.mxu1 %v427_v11 }
  0x2b   : > { %533 = vmatmul.f32.vlgmr.msrb.gmra.mxu3 %v431_v27  ;;  %593 = vmatmul.f32.vlgmr.msrb.gmra.mxu1 %v429_v18 }
  0x2e   : > { %508 = vmatmul.f32.gmra.mxu2 %v438_v20  ;;  %570 = vmatmul.f32.gmra.mxu0 %v437_v15 }
  0x33   : > { %539 = vmatmul.f32.gmra.mxu3 %v439_v25  ;;  %597 = vmatmul.f32.gmra.mxu1 %v437_v15 }
  0x84   : > { %v391_v36 = vpop.permute.xlu0 %390 }
  0x8c   : > { %v396_v43 = vpop.permute.xlu0 %395 }
  0x9b   : > { %v435_v34 = vpop.f32.mrf.mxu0 }
  0x9c   : > { %v436_v37 = vadd.f32 %v435_v34, %v391_v36 }
  0xa0   : > { %v474_v38 = vpop.f32.mrf.mxu1 }
  0xa1   : > { %v443_v35 = vpop.f32.mrf.mxu2  ;;  %v475_v40 = vadd.f32 %v474_v38, %v436_v37 }
  0xa2   : > { %v444_v47 = vadd.f32 %v443_v35, %v396_v43 }
  0xa3   : > { %v567_v44 = vpop.f32.mrf.mxu0 }
  0xa6   : > { %v478_v39 = vpop.f32.mrf.mxu3 }
  0xa7   : > { %v479_v52 = vadd.f32 %v478_v39, %v444_v47 }
  0xa8   : > { %v594_v46 = vpop.f32.mrf.mxu1 }
  0xa9   : > { %v504_v41 = vpop.f32.mrf.mxu2 }
  0xaa   : > { %v505_v42 = vadd.f32 %v504_v41, %v475_v40 }
  0xab   : > { %v571_v57 = vpop.f32.mrf.mxu0 }
  0xae   : > { %v534_v45 = vpop.f32.mrf.mxu3 }
  0xaf   : > { %v535_v48 = vadd.f32 %v534_v45, %v505_v42 }
  0xb0   : > { %v598_v59 = vpop.f32.mrf.mxu1 }
  0xb1   : > { %v568_v49 = vadd.f32 %v567_v44, %v535_v48  ;;  %v509_v51 = vpop.f32.mrf.mxu2 }
  0xb2   : > { %v510_v54 = vadd.f32 %v509_v51, %v479_v52 }
  0xb3   : > { %v595_v53 = vadd.f32 %v594_v46, %v568_v49 }
  0xb5   : > { %v605_v55 = vadd.f32 %v809_v50, %v595_v53 }
  0xb6   : > { %v540_v56 = vpop.f32.mrf.mxu3 }
  0xb7   : > { %608 = vst.msk [vmem:[%s374_s14] sm:$0xff] %vm607_vm1, %v605_v55  ;;  %v541_v58 = vadd.f32 %v540_v56, %v510_v54 }
  0xb9   : > { %v572_v60 = vadd.f32 %v571_v57, %v541_v58 }
  0xbb   : > { %v599_v61 = vadd.f32 %v598_v59, %v572_v60 }
  0xbd   : > { %v606_v62 = vadd.f32 %v809_v50, %v599_v61 }
  0xbf   : > { %610 = vst.msk [vmem:[%s374_s14 + $0x8] sm:$0x3] %vm609_vm2, %v606_v62 }
  0xc0 PF: > { %s15_s20 = sadd.s32 1, %s832_s20   ;;  %s930_s18 = smov %s828_s19 }
  0xc1   : > { %p12_p5 = scmp.ge.s32.totalorder %s15_s20, 4   ;;  %s931_s19 = smov %s933_s21 }
  0xc3   :  { %14 = sbr.rel (!%p12_p5) target bundleno = 2 (0x2), region = 79 }

</bundles_post_ra>
